<compile_context>
chip_gen: v6e
topology: v6e:2x2x1
jax: 0.10.0
libtpu: 0.0.40
codegen_flags: <defaults>
</compile_context>

<pallas_src>
import functools

import jax
import jax.numpy as jnp
from jax.experimental import pallas as pl
from jax.experimental.pallas import tpu as pltpu


def _round_up(x, m):
    return ((x + m - 1) // m) * m


def _choose_tile(n, t_max=256, t_min=128):
    # Keep >= 2 query tiles when possible (v7x megacore) and avoid padding
    # blowup for small graphs.  Tiles stay multiples of 128.
    t = t_max
    while t > t_min and _round_up(n, t) // t < 2:
        t //= 2
    return max(t, t_min)


# --------------------------------------------------------------------------
# Kernel 1: projection + fused score-vector precompute
# --------------------------------------------------------------------------
def _proj_kernel(x_ref, w_ref, a_ref, wh_ref, f_ref, g_ref):
    wh = jnp.dot(
        x_ref[...].astype(jnp.bfloat16),
        w_ref[...].astype(jnp.bfloat16),
        preferred_element_type=jnp.float32,
    )                                                   # [tm, Fp] f32
    wh_ref[...] = wh.astype(jnp.bfloat16)               # stored bf16
    a1 = a_ref[0:1, :]                                  # [1, Fp] f32
    a2 = a_ref[1:2, :]                                  # [1, Fp] f32
    # i-side score, [tm, 1]
    f_ref[...] = jnp.sum(wh * a1, axis=-1, keepdims=True)
    # j-side score, produced directly lane-major [1, tm] (no transpose later)
    g_ref[...] = jax.lax.dot_general(
        a2, wh, (((1,), (1,)), ((), ())), preferred_element_type=jnp.float32)


def _project(x_p, w_p, a_lane, *, tm):
    n_p, c_in = x_p.shape
    f_p = w_p.shape[1]
    return pl.pallas_call(
        _proj_kernel,
        out_shape=(
            jax.ShapeDtypeStruct((n_p, f_p), jnp.bfloat16),   # wh (bf16)
            jax.ShapeDtypeStruct((n_p, 1), jnp.float32),      # f
            jax.ShapeDtypeStruct((1, n_p), jnp.float32),      # g
        ),
        grid=(n_p // tm,),
        in_specs=[
            pl.BlockSpec((tm, c_in), lambda i: (i, 0)),
            pl.BlockSpec((c_in, f_p), lambda i: (0, 0)),
            pl.BlockSpec((2, f_p), lambda i: (0, 0)),
        ],
        out_specs=(
            pl.BlockSpec((tm, f_p), lambda i: (i, 0)),
            pl.BlockSpec((tm, 1), lambda i: (i, 0)),
            pl.BlockSpec((1, tm), lambda i: (0, i)),
        ),
        compiler_params=pltpu.CompilerParams(
            dimension_semantics=("parallel",),
            vmem_limit_bytes=32 * 1024 * 1024,
        ),
    )(x_p, w_p, a_lane)


# --------------------------------------------------------------------------
# Kernel 2: masked attention + aggregation with online (flash-style) softmax
# --------------------------------------------------------------------------
def _gat_attn_kernel(f_ref, g_ref, whk_ref, adj_ref, out_ref,
                     m_sc, l_sc, acc_sc, *, alpha):
    ki = pl.program_id(1)

    @pl.when(ki == 0)
    def _():
        m_sc[...] = jnp.full_like(m_sc, -jnp.inf)
        l_sc[...] = jnp.zeros_like(l_sc)
        acc_sc[...] = jnp.zeros_like(acc_sc)

    # Scores: e[i, j] = f[i] + g[j]  (both precomputed in the projection kernel)
    e = f_ref[...] + g_ref[...]                       # [tq, tk] f32

    # Fused LeakyReLU + adjacency mask.  alpha is static; for alpha < 1,
    # leakyrelu(e) == max(e, alpha*e); for alpha >= 1 it is min(e, alpha*e).
    if alpha <= 1.0:
        leaky = jnp.maximum(e, alpha * e)
    else:
        leaky = jnp.minimum(e, alpha * e)
    masked = jnp.where(adj_ref[...] > 0, leaky, jnp.float32(-9e15))

    # Online softmax update (m, l, acc in f32).
    m_prev = m_sc[...]
    m_new = jnp.maximum(m_prev, jnp.max(masked, axis=-1, keepdims=True))
    corr = jnp.exp(m_prev - m_new)
    p = jnp.exp(masked - m_new)
    l_sc[...] = corr * l_sc[...] + jnp.sum(p, axis=-1, keepdims=True)
    acc_sc[...] = corr * acc_sc[...] + jnp.dot(
        p.astype(jnp.bfloat16), whk_ref[...],          # whk already bf16
        preferred_element_type=jnp.float32)
    m_sc[...] = m_new

    # TODO(synk): nn.Dropout on the attention weights skipped (eval-mode identity).

    @pl.when(ki == pl.num_programs(1) - 1)
    def _():
        h = acc_sc[...] * pl.reciprocal(l_sc[...], approx=True)
        # ELU with clamped exp argument (no inf in the untaken branch).
        out_ref[...] = jnp.where(
            h > 0, h, jnp.exp(jnp.minimum(h, 0.0)) - 1.0
        ).astype(out_ref.dtype)


def _attention(wh_bf16, f_vec, g_vec, adj_i8, *, alpha, tq, tk):
    n_p, f_p = wh_bf16.shape
    kernel = functools.partial(_gat_attn_kernel, alpha=alpha)
    return pl.pallas_call(
        kernel,
        out_shape=jax.ShapeDtypeStruct((n_p, f_p), jnp.float32),
        grid_spec=pltpu.PrefetchScalarGridSpec(
            num_scalar_prefetch=0,
            grid=(n_p // tq, n_p // tk),
            in_specs=[
                pl.BlockSpec((tq, 1), lambda qi, ki: (qi, 0)),      # f (query)
                pl.BlockSpec((1, tk), lambda qi, ki: (0, ki)),      # g (key)
                pl.BlockSpec((tk, f_p), lambda qi, ki: (ki, 0)),    # wh keys bf16
                pl.BlockSpec((tq, tk), lambda qi, ki: (qi, ki)),    # adj int8
            ],
            out_specs=pl.BlockSpec((tq, f_p), lambda qi, ki: (qi, 0)),
            scratch_shapes=[
                pltpu.VMEM((tq, 1), jnp.float32),     # running max
                pltpu.VMEM((tq, 1), jnp.float32),     # running denom
                pltpu.VMEM((tq, f_p), jnp.float32),   # running numerator
            ],
        ),
        compiler_params=pltpu.CompilerParams(
            dimension_semantics=("parallel", "arbitrary"),
            vmem_limit_bytes=32 * 1024 * 1024,   # safe on v5e/v6e and v7x (64 MiB)
        ),
    )(f_vec, g_vec, wh_bf16, adj_i8)


# --------------------------------------------------------------------------
# Wrapper (padding + dtype plumbing)
# --------------------------------------------------------------------------
def gat_forward(x, w, a, adj, *, alpha, tile=256):
    n, c_in = x.shape
    f = w.shape[1]
    assert a.shape == (2 * f, 1)

    t = _choose_tile(n, t_max=tile)                 # tq == tk == t
    n_p = _round_up(n, t)
    f_p = _round_up(max(f, 128), 128)               # lane-dense wh / output

    x_p = jnp.zeros((n_p, c_in), jnp.float32).at[:n, :].set(x.astype(jnp.float32))
    w_p = jnp.zeros((c_in, f_p), jnp.float32).at[:, :f].set(w.astype(jnp.float32))
    a_lane = (jnp.zeros((2, f_p), jnp.float32)
              .at[0, :f].set(a[:f, 0].astype(jnp.float32))
              .at[1, :f].set(a[f:, 0].astype(jnp.float32)))
    # NOTE: for repeated forwards over a fixed graph, build adj_i8 once outside
    # the per-call path (it is an N^2 wrapper-side pass).  Predicate matches
    # the reference: adj > 0.
    adj_i8 = jnp.zeros((n_p, n_p), jnp.int8).at[:n, :n].set(
        (adj > 0).astype(jnp.int8))

    wh_bf16, f_vec, g_vec = _project(x_p, w_p, a_lane, tm=t)
    out_p = _attention(wh_bf16, f_vec, g_vec, adj_i8, alpha=alpha, tq=t, tk=t)
    return out_p[:n, :f]


# --------------------------------------------------------------------------
# Reference + test
# --------------------------------------------------------------------------
def _xavier_normal(key, shape):
    fan_in, fan_out = shape[0], shape[1]
    std = (2.0 / (fan_in + fan_out)) ** 0.5
    return std * jax.random.normal(key, shape, dtype=jnp.float32)


def _reference(x, w, a, adj, alpha):
    wh = x @ w
    f = w.shape[1]
    e = wh @ a[:f] + (wh @ a[f:]).T
    e = jnp.where(e > 0, e, alpha * e)
    attn = jnp.where(adj > 0, e, -9e15)
    attn = jax.nn.softmax(attn, axis=1)
    h = attn @ wh
    return jnp.where(h > 0, h, jnp.exp(jnp.minimum(h, 0.0)) - 1.0)


if __name__ == "__main__":
    num_nodes = 256          # exercises 2x2 (query, key) tiling at t=128
    in_channels = 16
    out_channels = 32
    alpha = 0.2

    key = jax.random.PRNGKey(0)
    kx, kw, ka, kadj = jax.random.split(key, 4)

    x = jax.random.normal(kx, (num_nodes, in_channels), dtype=jnp.float32)
    w = _xavier_normal(kw, (in_channels, out_channels))
    a = _xavier_normal(ka, (2 * out_channels, 1))

    # Random sparse adjacency with self-loops (so every row has an edge).
    adj = (jax.random.uniform(kadj, (num_nodes, num_nodes)) > 0.5).astype(jnp.float32)
    adj = jnp.maximum(adj, jnp.eye(num_nodes, dtype=jnp.float32))

    out = gat_forward(x, w, a, adj, alpha=alpha)
    out = jax.block_until_ready(out)

    ref = _reference(x, w, a, adj, alpha)
    assert out.shape == (num_nodes, out_channels)
    # Tolerance accounts for bf16 MXU operands / bf16-stored wh (f32 accumulate)
    # and the EUP approximate reciprocal in the softmax normalization.
    assert jnp.allclose(out, ref, atol=2e-2, rtol=2e-2), float(
        jnp.max(jnp.abs(out - ref)))

    print("KERNEL_OK")
</pallas_src>

<mosaic_0001>
module attributes {stable_mosaic.version = 11 : i64} {
  func.func @_proj_kernel(%arg0: i32, %arg1: memref<128x16xf32, #tpu.memory_space<vmem>>, %arg2: memref<16x128xf32, #tpu.memory_space<vmem>>, %arg3: memref<2x128xf32, #tpu.memory_space<vmem>>, %arg4: memref<128x128xbf16, #tpu.memory_space<vmem>>, %arg5: memref<128x1xf32, #tpu.memory_space<vmem>>, %arg6: memref<1x128xf32, #tpu.memory_space<vmem>>) attributes {dimension_semantics = [#tpu.dimension_semantics<parallel>], iteration_bounds = array<i64: 2>, scalar_prefetch = 0 : i64, scratch_operands = 0 : i64, tpu.core_type = #tpu.core_type<tc>, window_params = [{transform_indices = @transform_0, window_bounds = array<i64: 128, 16>}, {pipeline_mode = #tpu.pipeline_mode<synchronous>, transform_indices = @transform_1, window_bounds = array<i64: 16, 128>}, {pipeline_mode = #tpu.pipeline_mode<synchronous>, transform_indices = @transform_2, window_bounds = array<i64: 2, 128>}, {transform_indices = @transform_3, window_bounds = array<i64: 128, 128>}, {transform_indices = @transform_4, window_bounds = array<i64: 128, 1>}, {transform_indices = @transform_5, window_bounds = array<i64: 1, 128>}]} {
    %c0 = arith.constant 0 : index
    %c0_0 = arith.constant 0 : index
    %0 = vector.load %arg1[%c0, %c0_0] : memref<128x16xf32, #tpu.memory_space<vmem>>, vector<128x16xf32>
    %1 = arith.truncf %0 : vector<128x16xf32> to vector<128x16xbf16>
    %c0_1 = arith.constant 0 : index
    %c0_2 = arith.constant 0 : index
    %2 = vector.load %arg2[%c0_1, %c0_2] : memref<16x128xf32, #tpu.memory_space<vmem>>, vector<16x128xf32>
    %3 = arith.truncf %2 : vector<16x128xf32> to vector<16x128xbf16>
    %cst = arith.constant dense<0.000000e+00> : vector<128x128xf32>
    %4 = tpu.matmul %1, %3, %cst {dimension_numbers = #tpu.dot_dimension_numbers<[1], [0], [0], [1], [0, 0, 1, 1], [], []>} : vector<128x16xbf16>, vector<16x128xbf16>, vector<128x128xf32> -> vector<128x128xf32>
    %5 = arith.truncf %4 : vector<128x128xf32> to vector<128x128xbf16>
    %c0_3 = arith.constant 0 : index
    %c0_4 = arith.constant 0 : index
    %6 = vector.load %arg4[%c0_3, %c0_4] : memref<128x128xbf16, #tpu.memory_space<vmem>>, vector<128x128xbf16>
    tpu.vector_store %arg4[%c0_3, %c0_4], %5 {strides = array<i32>} : memref<128x128xbf16, #tpu.memory_space<vmem>>, vector<128x128xbf16>,
    %c0_5 = arith.constant 0 : index
    %c0_6 = arith.constant 0 : index
    %7 = vector.load %arg3[%c0_5, %c0_6] : memref<2x128xf32, #tpu.memory_space<vmem>>, vector<1x128xf32>
    %c1 = arith.constant 1 : index
    %c0_7 = arith.constant 0 : index
    %8 = vector.load %arg3[%c1, %c0_7] : memref<2x128xf32, #tpu.memory_space<vmem>>, vector<1x128xf32>
    %9 = vector.broadcast %7 : vector<1x128xf32> to vector<128x128xf32>
    %10 = arith.mulf %4, %9 : vector<128x128xf32>
    %cst_8 = arith.constant dense<0.000000e+00> : vector<128xf32>
    %11 = vector.multi_reduction <add>, %10, %cst_8 [1] : vector<128x128xf32> to vector<128xf32>
    %12 = vector.shape_cast %11 : vector<128xf32> to vector<128x1xf32>
    %c0_9 = arith.constant 0 : index
    %c0_10 = arith.constant 0 : index
    %13 = vector.load %arg5[%c0_9, %c0_10] : memref<128x1xf32, #tpu.memory_space<vmem>>, vector<128x1xf32>
    tpu.vector_store %arg5[%c0_9, %c0_10], %12 {strides = array<i32>} : memref<128x1xf32, #tpu.memory_space<vmem>>, vector<128x1xf32>,
    %cst_11 = arith.constant dense<0.000000e+00> : vector<1x128xf32>
    %14 = tpu.matmul %8, %4, %cst_11 {dimension_numbers = #tpu.dot_dimension_numbers<[1], [1], [0], [0], [0, 0, 1, 0], [], []>} : vector<1x128xf32>, vector<128x128xf32>, vector<1x128xf32> -> vector<1x128xf32>
    %c0_12 = arith.constant 0 : index
    %c0_13 = arith.constant 0 : index
    %15 = vector.load %arg6[%c0_12, %c0_13] : memref<1x128xf32, #tpu.memory_space<vmem>>, vector<1x128xf32>
    tpu.vector_store %arg6[%c0_12, %c0_13], %14 {strides = array<i32>} : memref<1x128xf32, #tpu.memory_space<vmem>>, vector<1x128xf32>,
    return
  }
  func.func @transform_0(%arg0: i32) -> (i32, i32) {
    %c0_i32 = arith.constant 0 : i32
    %c0_i32_0 = arith.constant 0 : i32
    return %arg0, %c0_i32 : i32, i32
  }
  func.func @transform_1(%arg0: i32) -> (i32, i32) {
    %c0_i32 = arith.constant 0 : i32
    %c0_i32_0 = arith.constant 0 : i32
    %c0_i32_1 = arith.constant 0 : i32
    return %c0_i32, %c0_i32_0 : i32, i32
  }
  func.func @transform_2(%arg0: i32) -> (i32, i32) {
    %c0_i32 = arith.constant 0 : i32
    %c0_i32_0 = arith.constant 0 : i32
    %c0_i32_1 = arith.constant 0 : i32
    return %c0_i32, %c0_i32_0 : i32, i32
  }
  func.func @transform_3(%arg0: i32) -> (i32, i32) {
    %c0_i32 = arith.constant 0 : i32
    %c0_i32_0 = arith.constant 0 : i32
    return %arg0, %c0_i32 : i32, i32
  }
  func.func @transform_4(%arg0: i32) -> (i32, i32) {
    %c0_i32 = arith.constant 0 : i32
    %c0_i32_0 = arith.constant 0 : i32
    return %arg0, %c0_i32 : i32, i32
  }
  func.func @transform_5(%arg0: i32) -> (i32, i32) {
    %c0_i32 = arith.constant 0 : i32
    %c0_i32_0 = arith.constant 0 : i32
    return %c0_i32, %arg0 : i32, i32
  }
}

</mosaic_0001>

<bundles_post_ra>
// kernel: tpu_custom_call.1
= control target key start
LH: loop header
LB: loop body
LE: loop exit
PB: predicated region body
PF: predicated region fallthrough
CT: control target
= control target key end

     0   :  { %11 = vsyncpa [#allocation3], 0  ;;  %s1431_s0 = inlined_call_operand.vmem [shape: f32[256,16], index: 0, kind: input, shape index: {}]   ;;  %s1432_s1 = inlined_call_operand.vmem [shape: f32[16,128], index: 1, kind: input, shape index: {}]   ;;  %s1433_s2 = inlined_call_operand.vmem [shape: f32[2,128], index: 2, kind: input, shape index: {}]   ;;  %s1434_s3 = inlined_call_operand.hbm [shape: bf16[256,128], index: 3, kind: output, shape index: {0}]   ;;  %s1435_s4 = inlined_call_operand.vmem [shape: f32[256,1], index: 4, kind: output, shape index: {1}]   ;;  %s1436_s5 = inlined_call_operand.hbm [shape: f32[1,256], index: 5, kind: output, shape index: {2}]  }
   0x1   :  { %13 = vsyncpa [#allocation3 + $0x1], 0 }
   0x2   :  { %14 = vsyncpa [#allocation5], 0 }
   0x3   :  { %16 = vsyncpa [#allocation5 + $0x1], 0  ;;  %s1135_s18 = smov 0   ;;  %s1137_s19 = smov 0  }
   0x4   :  { %s1139_s20 = smov 0   ;;  %s1141_s21 = smov 0  }
   0x5 LB: > { %s1156_s22 = sadd.s32 4294967295, %s1097_s21   ;;  %s776_s23 = sadd.s32 4294967294, %s1097_s21   ;;  %s1097_s21 = sphi %s1141_s21, %s1442_s21   ;;  %s1093_s20 = sphi %s1139_s20, %s1441_s20   ;;  %s1089_s19 = sphi %s1137_s19, %s1440_s19   ;;  %s1085_s18 = sphi %s1135_s18, %s1439_s18  }
   0x6   : > { %s1160_s24 = sadd.s32 1, %s1097_s21   ;;  %s97_s25 = sadd.s32 1, %s1093_s20 }
   0x7   : > { %s94_s26 = ssub.s32 %s1097_s21, %s1160_s24  ;;  %p107_p0 = scmp.ne.s32.totalorder %s1093_s20, %s1089_s19 }
   0x8   : > { %p95_p1 = scmp.eq.s32.totalorder %s94_s26, 0  ;;  %p108_p2 = scmp.eq.s32.totalorder %s1156_s22, 1 }
   0x9   : > { %p113_p3 = scmp.ne.s32.totalorder %s1089_s19, %s1085_s18  ;;  %p114_p4 = scmp.eq.s32.totalorder %s776_s23, 1 }
   0xa   : > { %s1171_s27 = scalar_select %p95_p1, %s1093_s20, %s97_s25  }
   0xb   : > { %p1173_p5 = por %p108_p2, %p107_p0  ;;  %p1177_p6 = por %p114_p4, %p113_p3 }
   0xc   : > { %p779_p7 = scmp.ge.s32.totalorder %s1097_s21, 1  ;;  %p199_p8 = scmp.lt.s32.totalorder %s1097_s21, 3 }
   0xe   : > { %p200_p9 = pnand %p779_p7, %p199_p8 }
   0xf   : > { %s1190_s9 = sshll.u32 (!%p200_p9), %s1156_s22, 4  ;;  %s1236_s17 = sand.u32 (!%p200_p9), 1, %s1089_s19  }
  0x10   : > { %203 = sbr.rel (%p200_p9) target bundleno = 520 (0x208), region = 32  ;;  %p237_p10 = scmp.lt.s32.totalorder (!%p200_p9), %s1190_s9, 31 }
  0x11   : > { %s780_s23 = sshll.u32 (!%p200_p9), %s1236_s17, 6  ;;  %s622_s15 = scalar_lea.sflag (!%p200_p9), [#allocation3], %s1236_s17 }
  0x12   : > { %s1255_s25 = scalar_lea.vmem (!%p200_p9), [#allocation2], %s780_s23 }
  0x15   : > { %v274_v0 = vld [vmem:[%s1432_s1] sm:$0xff]  ;;  %v275_v1 = vld [vmem:[%s1432_s1 + $0x8] sm:$0xff]  ;;  %s1194_s10 = scalar_select %p237_p10, %s1190_s9, 31  ;;  %vm277_vm0 = vcmask 130048   ;;  %v1099_v27 = vmov 0.0   ;;  %vm1100_vm1 = vmmov 0  }
  0x16   : > { %v276_v2 = vpack.c.bf16 %v275_v1, %v274_v0  ;;  %924 = vmatprep.subr.mxu1 %v1099_v27  ;;  %956 = vmatprep.mubr.msk.f32.mxu1 %vm1100_vm1, %v1099_v27  ;;  %v1233_v28 = vld [vmem:[%s1433_s2] ss:$0 sm:$0xff]  ;;  %vm533_vm2 = vcmask 7168  }
  0x17   : > { %s782_s11 = sshll.u32 %s1194_s10, 3  ;;  %s832_s10 = sshll.u32 %s1156_s22, 10 }
  0x18   : > { %906 = vmatprep.subr.bf16.mxu0 %v276_v2  ;;  %s1202_s14 = scalar_lea.vmem %s1431_s0, %s782_s11  ;;  %s1318_s8 = scalar_lea.vmem %s1435_s4, %s782_s11 }
  0x19   : > { %907 = vmatpush3.bf16.msra.mxu0 %v276_v2  ;;  %v250_v3 = vld [vmem:[%s1202_s14] sm:$0xff]  ;;  %v251_v4 = vld [vmem:[%s1202_s14 + $0x8] sm:$0xff]  ;;  %v252_v5 = vld [vmem:[%s1202_s14 + $0x10] sm:$0xff]  ;;  %s1340_s13 = scalar_lea.hbm %s1434_s3, %s832_s10  ;;  %s1101_s22 = smov [#allocation2]  }
  0x1a   : > { %v266_v6 = vpack.c.bf16 %v251_v4, %v250_v3  ;;  %v253_v7 = vld [vmem:[%s1202_s14 + $0x18] sm:$0xff]  ;;  %v254_v8 = vld [vmem:[%s1202_s14 + $0x20] sm:$0xff]  ;;  %v255_v9 = vld [vmem:[%s1202_s14 + $0x28] sm:$0xff]  ;;  %s1011_s23 = sshll.u32 %s1101_s22, 4  ;;  %s1012_s23 = int_to_ptr.vmem [resolvable:$false] %s1011_s23 }
  0x1b   : > { %v267_v10 = vpack.c.bf16 %v253_v7, %v252_v5  ;;  %v268_v11 = vpack.c.bf16 %v255_v9, %v254_v8  ;;  %v256_v12 = vld [vmem:[%s1202_s14 + $0x30] sm:$0xff]  ;;  %v257_v13 = vld [vmem:[%s1202_s14 + $0x38] sm:$0xff]  ;;  %v258_v14 = vld [vmem:[%s1202_s14 + $0x40] sm:$0xff]  ;;  %s1013_s26 = scalar_lea.vmem %s1012_s23, 2048 }
  0x1c   : > { %908 = vmatprep.mubr.msk.bf16.mxu0 %vm277_vm0, %v266_v6  ;;  %v259_v15 = vld [vmem:[%s1202_s14 + $0x48] sm:$0xff]  ;;  %v269_v16 = vpack.c.bf16 %v257_v13, %v256_v12  ;;  %v260_v18 = vld [vmem:[%s1202_s14 + $0x50] sm:$0xff]  ;;  %v261_v19 = vld [vmem:[%s1202_s14 + $0x58] sm:$0xff] }
  0x1d   : > { %909 = vmatmul.mubr.msk.bf16.vlgmr.msra.gmra.mxu0 %vm277_vm0, %v267_v10  ;;  %v270_v17 = vpack.c.bf16 %v259_v15, %v258_v14  ;;  %v262_v20 = vld [vmem:[%s1202_s14 + $0x60] sm:$0xff]  ;;  %v263_v21 = vld [vmem:[%s1202_s14 + $0x68] sm:$0xff]  ;;  %v271_v22 = vpack.c.bf16 %v261_v19, %v260_v18  ;;  %v264_v24 = vld [vmem:[%s1202_s14 + $0x70] sm:$0xff] }
  0x1e   : > { %912 = vmatprep.mubr.msk.bf16.mxu0 %vm277_vm0, %v268_v11  ;;  %v272_v23 = vpack.c.bf16 %v263_v21, %v262_v20  ;;  %v265_v25 = vld [vmem:[%s1202_s14 + $0x78] sm:$0xff]  ;;  %v480_v5 = vld [vmem:[%s1433_s2 + $0x1] sm:$0x1]  ;;  %s644_s14 = sshll.u32 %s1255_s25, 4  ;;  %s1345_s14 = int_to_ptr.vmem [resolvable:$true] %s644_s14 }
  0x1f   : > { %v273_v26 = vpack.c.bf16 %v265_v25, %v264_v24  ;;  %s1007_s16 = scalar_lea.vmem %s1345_s14, 1024  ;;  %p1014_p0 = scmp.lt.s32.totalorder %s1345_s14, %s1012_s23 }
  0x20   : > { %p1008_p11 = scmp.ne.s32.totalorder %s1345_s14, %s1007_s16  ;;  %p1015_p1 = scmp.lt.s32.totalorder %s1013_s26, %s1007_s16 }
  0x22   : > { %p1009_p12 = pnand %p1008_p11, %p1173_p5  ;;  %p1016_p2 = por %p1015_p1, %p1014_p0 }
  0x24   : > { %p1010_p13 = pneg %p1009_p12 }
  0x25   : > { %913 = vmatmul.mubr.msk.bf16.gmra.mxu0 %vm277_vm0, %v269_v16 }
  0x26   : > { %916 = vmatprep.mubr.msk.bf16.mxu0 %vm277_vm0, %v270_v17  ;;  %p1017_p3 = pnand %p1016_p2, %p1010_p13 }
  0x2d   : > { %917 = vmatmul.mubr.msk.bf16.gmra.mxu0 %vm277_vm0, %v271_v22 }
  0x2e   : > { %920 = vmatprep.mubr.msk.bf16.mxu0 %vm277_vm0, %v272_v23 }
  0x35   : > { %921 = vmatmul.mubr.msk.bf16.gmra.mxu0 %vm277_vm0, %v273_v26 }
  0xdd   : > { %v1238_v29 = vpop.f32.mrf.mxu0 }
  0xde   : > { %v487_v30 = vmul.f32 %v1238_v29, %v1233_v28 }
  0xdf   : > { %v1243_v31 = vpop.f32.mrf.mxu0 }
  0xe0   : > { %505 = vadd.xlane.f32.xlu1 %v487_v30  ;;  %v485_v32 = vmul.f32 %v1233_v28, %v1243_v31 }
  0xe1   : > { %v1247_v33 = vpop.f32.mrf.mxu0 }
  0xe2   : > { %v841_v34 = vpack.c.bf16 %v1247_v33, %v1238_v29  ;;  %501 = vadd.xlane.f32.xlu0 %v485_v32  ;;  %v488_v35 = vmul.f32 %v1247_v33, %v1233_v28 }
  0xe3   : > { %v1253_v36 = vpop.f32.mrf.mxu0 }
  0xe4   : > { %873 = vst [vmem:[%s1255_s25 + $0x8] sm:$0xff] %v841_v34   ;;  %v836_v37 = vpack.c.bf16 %v1253_v36, %v1243_v31  ;;  %507 = vadd.xlane.f32.xlu1 %v488_v35  ;;  %v486_v38 = vmul.f32 %v1233_v28, %v1253_v36 }
  0xe5   : > { %v1262_v39 = vpop.f32.mrf.mxu0 }
  0xe6   : > { %837 = vst [vmem:[%s1255_s25] sm:$0xff] %v836_v37   ;;  %503 = vadd.xlane.f32.xlu0 %v486_v38  ;;  %v491_v41 = vmul.f32 %v1262_v39, %v1233_v28 }
  0xe7   : > { %v1265_v40 = vpop.f32.mrf.mxu0 }
  0xe8   : > { %v489_v47 = vmul.f32 %v1233_v28, %v1265_v40 }
  0xe9   : > { %v915_v42 = vpop.f32.mrf.mxu0 }
  0xea   : > { %v851_v43 = vpack.c.bf16 %v915_v42, %v1262_v39  ;;  %513 = vadd.xlane.f32.xlu0 %v491_v41  ;;  %v492_v44 = vmul.f32 %v915_v42, %v1233_v28 }
  0xeb   : > { %v355_v45 = vpop.f32.mrf.mxu0 }
  0xec   : > { %875 = vst [vmem:[%s1255_s25 + $0x18] sm:$0xff] %v851_v43   ;;  %v846_v46 = vpack.c.bf16 %v355_v45, %v1265_v40  ;;  %515 = vadd.xlane.f32.xlu1 %v492_v44  ;;  %v490_v49 = vmul.f32 %v1233_v28, %v355_v45 }
  0xed   : > { %v918_v48 = vpop.f32.mrf.mxu0 }
  0xee   : > { %874 = vst [vmem:[%s1255_s25 + $0x10] sm:$0xff] %v846_v46   ;;  %509 = vadd.xlane.f32.xlu0 %v489_v47  ;;  %v495_v51 = vmul.f32 %v918_v48, %v1233_v28 }
  0xef   : > { %v368_v50 = vpop.f32.mrf.mxu0 }
  0xf0   : > { %511 = vadd.xlane.f32.xlu1 %v490_v49  ;;  %v493_v57 = vmul.f32 %v1233_v28, %v368_v50 }
  0xf1   : > { %v919_v52 = vpop.f32.mrf.mxu0 }
  0xf2   : > { %v861_v53 = vpack.c.bf16 %v919_v52, %v918_v48  ;;  %521 = vadd.xlane.f32.xlu0 %v495_v51  ;;  %v496_v54 = vmul.f32 %v919_v52, %v1233_v28 }
  0xf3   : > { %v371_v55 = vpop.f32.mrf.mxu0 }
  0xf4   : > { %877 = vst [vmem:[%s1255_s25 + $0x28] sm:$0xff] %v861_v53   ;;  %v856_v56 = vpack.c.bf16 %v371_v55, %v368_v50  ;;  %523 = vadd.xlane.f32.xlu1 %v496_v54  ;;  %v494_v59 = vmul.f32 %v1233_v28, %v371_v55 }
  0xf5   : > { %v922_v58 = vpop.f32.mrf.mxu0 }
  0xf6   : > { %876 = vst [vmem:[%s1255_s25 + $0x20] sm:$0xff] %v856_v56   ;;  %517 = vadd.xlane.f32.xlu0 %v493_v57  ;;  %v499_v2 = vmul.f32 %v922_v58, %v1233_v28 }
  0xf7   : > { %v384_v60 = vpop.f32.mrf.mxu0 }
  0xf8   : > { %519 = vadd.xlane.f32.xlu1 %v494_v59  ;;  %v497_v61 = vmul.f32 %v1233_v28, %v384_v60 }
  0xf9   : > { %v923_v62 = vpop.f32.mrf.mxu0 }
  0xfa   : > { %v871_v63 = vpack.c.bf16 %v923_v62, %v922_v58  ;;  %525 = vadd.xlane.f32.xlu0 %v497_v61  ;;  %925 = vmatpush3.xpose.msra.mxu1 %v923_v62  ;;  %v500_v4 = vmul.f32 %v923_v62, %v1233_v28 }
  0xfb   : > { %v387_v0 = vpop.f32.mrf.mxu0  ;;  %926 = vmatprep.subr.mxu1 %v1099_v27 }
  0xfc   : > { %879 = vst [vmem:[%s1255_s25 + $0x38] sm:$0xff] %v871_v63   ;;  %v866_v1 = vpack.c.bf16 %v387_v0, %v384_v60  ;;  %v498_v3 = vmul.f32 %v1233_v28, %v387_v0 }
  0xfe   : > { %878 = vst [vmem:[%s1255_s25 + $0x30] sm:$0xff] %v866_v1   ;;  %529 = vadd.xlane.f32.xlu0 %v499_v2  ;;  %927 = vmatpush3.xpose.msra.mxu1 %v922_v58 }
  0xff   : > { %527 = vadd.xlane.f32.xlu1 %v498_v3  ;;  %928 = vmatprep.subr.mxu1 %v1099_v27 }
 0x102   : > { %929 = vmatpush3.xpose.msra.mxu1 %v387_v0 }
 0x103   : > { %531 = vadd.xlane.f32.xlu1 %v500_v4  ;;  %930 = vmatprep.subr.mxu1 %v1099_v27 }
 0x106   : > { %931 = vmatpush3.xpose.msra.mxu1 %v384_v60 }
 0x107   : > { %932 = vmatprep.subr.mxu1 %v1099_v27 }
 0x10a   : > { %933 = vmatpush3.xpose.msra.mxu1 %v919_v52 }
 0x10b   : > { %934 = vmatprep.subr.mxu1 %v1099_v27 }
 0x10e   : > { %935 = vmatpush3.xpose.msra.mxu1 %v918_v48 }
 0x10f   : > { %936 = vmatprep.subr.mxu1 %v1099_v27 }
 0x112   : > { %937 = vmatpush3.xpose.msra.mxu1 %v371_v55 }
 0x113   : > { %938 = vmatprep.subr.mxu1 %v1099_v27 }
 0x116   : > { %939 = vmatpush3.xpose.msra.mxu1 %v368_v50 }
 0x117   : > { %940 = vmatprep.subr.mxu1 %v1099_v27 }
 0x11a   : > { %941 = vmatpush3.xpose.msra.mxu1 %v915_v42 }
 0x11b   : > { %942 = vmatprep.subr.mxu1 %v1099_v27 }
 0x11e   : > { %943 = vmatpush3.xpose.msra.mxu1 %v1262_v39 }
 0x11f   : > { %944 = vmatprep.subr.mxu1 %v1099_v27 }
 0x122   : > { %945 = vmatpush3.xpose.msra.mxu1 %v355_v45 }
 0x123   : > { %946 = vmatprep.subr.mxu1 %v1099_v27 }
 0x126   : > { %947 = vmatpush3.xpose.msra.mxu1 %v1265_v40 }
 0x127   : > { %948 = vmatprep.subr.mxu1 %v1099_v27 }
 0x12a   : > { %949 = vmatpush3.xpose.msra.mxu1 %v1247_v33 }
 0x12b   : > { %950 = vmatprep.subr.mxu1 %v1099_v27 }
 0x12e   : > { %951 = vmatpush3.xpose.msra.mxu1 %v1238_v29 }
 0x12f   : > { %952 = vmatprep.subr.mxu1 %v1099_v27 }
 0x132   : > { %953 = vmatpush3.xpose.msra.mxu1 %v1253_v36 }
 0x133   : > { %954 = vmatprep.subr.mxu1 %v1099_v27 }
 0x136   : > { %955 = vmatpush3.xpose.msra.mxu1 %v1243_v31 }
 0x139   : > { %957 = vmatmul.mubr.f32.vlgmr.msra.gmra.mxu1 %v480_v5 }
 0x169   : > { %v506_v6 = vpop.xlane.xlu1 %505 }
 0x16a   : > { %536 = vst.msk [vmem:[%s1318_s8 + $0x10] sm:$0xff] %vm533_vm2, %v506_v6 }
 0x16b   : > { %v502_v7 = vpop.xlane.xlu0 %501 }
 0x16c   : > { %534 = vst.msk [vmem:[%s1318_s8] sm:$0xff] %vm533_vm2, %v502_v7 }
 0x16d   : > { %v508_v8 = vpop.xlane.xlu1 %507 }
 0x16e   : > { %537 = vst.msk [vmem:[%s1318_s8 + $0x18] sm:$0xff] %vm533_vm2, %v508_v8 }
 0x16f   : > { %v504_v9 = vpop.xlane.xlu0 %503 }
 0x170   : > { %535 = vst.msk [vmem:[%s1318_s8 + $0x8] sm:$0xff] %vm533_vm2, %v504_v9 }
 0x173   : > { %v514_v10 = vpop.xlane.xlu0 %513 }
 0x174   : > { %540 = vst.msk [vmem:[%s1318_s8 + $0x30] sm:$0xff] %vm533_vm2, %v514_v10 }
 0x175   : > { %v516_v11 = vpop.xlane.xlu1 %515 }
 0x176   : > { %541 = vst.msk [vmem:[%s1318_s8 + $0x38] sm:$0xff] %vm533_vm2, %v516_v11 }
 0x177   : > { %v510_v12 = vpop.xlane.xlu0 %509 }
 0x178   : > { %538 = vst.msk [vmem:[%s1318_s8 + $0x20] sm:$0xff] %vm533_vm2, %v510_v12 }
 0x179   : > { %v512_v13 = vpop.xlane.xlu1 %511 }
 0x17a   : > { %539 = vst.msk [vmem:[%s1318_s8 + $0x28] sm:$0xff] %vm533_vm2, %v512_v13 }
 0x17b   : > { %v522_v14 = vpop.xlane.xlu0 %521 }
 0x17c   : > { %544 = vst.msk [vmem:[%s1318_s8 + $0x50] sm:$0xff] %vm533_vm2, %v522_v14 }
 0x17d   : > { %v524_v15 = vpop.xlane.xlu1 %523 }
 0x17e   : > { %545 = vst.msk [vmem:[%s1318_s8 + $0x58] sm:$0xff] %vm533_vm2, %v524_v15 }
 0x17f   : > { %1020 = shalt.err (!%p1017_p3)
}
 0x180   : > { %s1021_s25 = scalar_lea.hbm %s1340_s13, 1024  ;;  %s1025_s7 = scalar_lea.hbm %s1434_s3, 2048 }
 0x181   : > { %p1022_p4 = scmp.ne.s32.totalorder %s1340_s13, %s1021_s25  ;;  %p1026_p9 = scmp.lt.s32.totalorder %s1340_s13, %s1434_s3 }
 0x182   : > { %p1027_p10 = scmp.lt.s32.totalorder %s1025_s7, %s1021_s25 }
 0x183   : > { %p1023_p7 = pnand %p1022_p4, %p1173_p5 }
 0x184   : > { %p1028_p11 = por %p1027_p10, %p1026_p9 }
 0x185   : > { %p1024_p8 = pneg %p1023_p7 }
 0x187   : > { %p1029_p12 = pnand %p1028_p11, %p1024_p8 }
 0x189   : > { %1032 = shalt.err (!%p1029_p12)
}
 0x18a   : > { %s1102_s12 = smov 64   ;;  %s1103_s16 = smov 4   ;;  %v518_v16 = vpop.xlane.xlu0 %517  ;;  %v520_v17 = vpop.xlane.xlu1 %519 }
 0x18b   : > { %959 = dma.vmem_to_hbm [thread:$0]  (%p1173_p5), %s1345_s14, 1024, %s1340_s13, %s622_s15, %s1102_s12, %s1102_s12, %s1103_s16  }
 0x18c   : > { %542 = vst.msk [vmem:[%s1318_s8 + $0x40] sm:$0xff] %vm533_vm2, %v518_v16  ;;  %543 = vst.msk [vmem:[%s1318_s8 + $0x48] sm:$0xff] %vm533_vm2, %v520_v17  ;;  %s235_s13 = scalar_lea.vmem [#allocation4], %s1236_s17  ;;  %s1391_s23 = scalar_lea.hbm %s1436_s5, %s1190_s9 }
 0x18d   : > { %s664_s14 = sshll.u32 %s235_s13, 4  ;;  %s632_s26 = scalar_lea.sflag [#allocation5], %s1236_s17  ;;  %s1385_s14 = int_to_ptr.vmem [resolvable:$true] %s664_s14 }
 0x18e   : > { %v526_v18 = vpop.xlane.xlu0 %525  ;;  %v528_v20 = vpop.xlane.xlu1 %527  ;;  %s1033_s25 = scalar_lea.vmem %s1385_s14, 16 }
 0x18f   : > { %546 = vst.msk [vmem:[%s1318_s8 + $0x60] sm:$0xff] %vm533_vm2, %v526_v18  ;;  %547 = vst.msk [vmem:[%s1318_s8 + $0x68] sm:$0xff] %vm533_vm2, %v528_v20  ;;  %p1034_p13 = scmp.ne.s32.totalorder %s1385_s14, %s1033_s25 }
 0x191   : > { %p1035_p0 = pnand %p1034_p13, %p1173_p5 }
 0x192   : > { %v530_v19 = vpop.xlane.xlu0 %529  ;;  %v532_v21 = vpop.xlane.xlu1 %531 }
 0x193   : > { %548 = vst.msk [vmem:[%s1318_s8 + $0x70] sm:$0xff] %vm533_vm2, %v530_v19  ;;  %549 = vst.msk [vmem:[%s1318_s8 + $0x78] sm:$0xff] %vm533_vm2, %v532_v21  ;;  %p1036_p1 = pneg %p1035_p0  ;;  %s1104_s8 = smov [#allocation4]  }
 0x194   : > { %s1037_s30 = sshll.u32 %s1104_s8, 4  ;;  %s1038_s30 = int_to_ptr.vmem [resolvable:$false] %s1037_s30 }
 0x195   : > { %s1039_s6 = scalar_lea.vmem %s1038_s30, 32  ;;  %p1040_p2 = scmp.lt.s32.totalorder %s1385_s14, %s1038_s30 }
 0x196   : > { %p1041_p3 = scmp.lt.s32.totalorder %s1039_s6, %s1033_s25 }
 0x198   : > { %p1042_p4 = por %p1041_p3, %p1040_p2 }
 0x19a   : > { %p1043_p7 = pnand %p1042_p4, %p1036_p1 }
 0x1f9   : > { %v616_v22 = vpop.f32.mrf.mxu1 }
 0x1fa   : > { %620 = vst [vmem:[%s235_s13] sm:$0x1] %v616_v22 }
 0x1fb   : > { %v958_v23 = vpop.f32.mrf.mxu1 }
 0x1fc   : > { %1046 = shalt.err (!%p1043_p7)
}
 0x1fd   : > { %s1047_s9 = scalar_lea.hbm %s1391_s23, 16  ;;  %s1051_s10 = scalar_lea.hbm %s1436_s5, 32 }
 0x1fe   : > { %p1048_p8 = scmp.ne.s32.totalorder %s1391_s23, %s1047_s9  ;;  %p1052_p11 = scmp.lt.s32.totalorder %s1391_s23, %s1436_s5 }
 0x1ff   : > { %p1053_p12 = scmp.lt.s32.totalorder %s1051_s10, %s1047_s9 }
 0x200   : > { %p1049_p9 = pnand %p1048_p8, %p1173_p5 }
 0x201   : > { %p1054_p13 = por %p1053_p12, %p1052_p11 }
 0x202   : > { %p1050_p10 = pneg %p1049_p9 }
 0x204   : > { %p1055_p0 = pnand %p1054_p13, %p1050_p10 }
 0x206   : > { %1058 = shalt.err (!%p1055_p0)
}
 0x207   : > { %960 = dma.vmem_to_hbm [thread:$0]  (%p1173_p5), %s1385_s14, 16, %s1391_s23, %s632_s26  }
 0x208 PF: > { %p970_p1 = scmp.ge.s32.totalorder %s1097_s21, 2  ;;  %s676_s16 = sand.u32 1, %s1085_s18  }
 0x209   : > { %s677_s13 = scalar_lea.sflag [#allocation3], %s676_s16 }
 0x20a   : > { %p964_p2 = pnand %p970_p1, %p1177_p6 }
 0x20c   : > { %p965_p3 = pneg %p964_p2 }
 0x20e   : > { %1076 = dma.done.wait (%p965_p3), %s677_s13, 1024  }
 0x20f   : > { %1078 = vsyncadd (%p965_p3), %s677_s13, 4294966272  ;;  %s694_s15 = scalar_lea.sflag [#allocation5], %s676_s16 }
 0x210   : > { %1080 = dma.done.wait (%p965_p3), %s694_s15, 16  }
 0x211   : > { %1082 = vsyncadd (%p965_p3), %s694_s15, 4294967280  ;;  %p19_p5 = scmp.ge.s32.totalorder %s1160_s24, 4   ;;  %s1439_s18 = smov %s1089_s19 }
 0x212   : > { %s1440_s19 = smov %s1093_s20  ;;  %s1441_s20 = smov %s1171_s27 }
 0x213   : > { %s1442_s21 = smov %s1160_s24  ;;  %21 = sbr.rel (!%p19_p5) target bundleno = 5 (0x5), region = 96 }
 0x218   :  { %698 = vsyncpa [#allocation3], 1 }
 0x219   :  { %700 = vsyncpa [#allocation3 + $0x1], 1 }
 0x21a   :  { %701 = vsyncpa [#allocation5], 1 }
 0x21b   :  { %703 = vsyncpa [#allocation5 + $0x1], 1 }

</bundles_post_ra>
